<compile_context>
chip_gen: v7x
topology: tpu7x:2x2x1
jax: 0.10.0
libtpu: 0.0.40
codegen_flags: <defaults>
</compile_context>

<pallas_src>
import functools

import jax
import jax.numpy as jnp
from jax.experimental import pallas as pl
from jax.experimental.pallas import tpu as pltpu


# ----------------------------------------------------------------------------- kernel


def _make_kernel(n_layers):
    """Kernel refs: (x, w_1, b_1, ..., w_L, b_L, out).

    Shapes (channels on sublanes, pixels on lanes):
      x   : (C_0, tile_p)    compute dtype (bf16 or f32)
      w_l : (C_l, C_{l-1})   compute dtype
      b_l : (C_l, 1)         f32
      out : (C_L, tile_p)    out dtype
    """

    def kernel(*refs):
        x_ref = refs[0]
        o_ref = refs[1 + 2 * n_layers]
        compute_dtype = x_ref.dtype
        h = x_ref[...]
        for l in range(n_layers):
            w = refs[1 + 2 * l][...].astype(compute_dtype)      # (C_out, C_in)
            b = refs[2 + 2 * l][...].astype(jnp.float32)        # (C_out, 1)
            acc = jnp.dot(w, h, preferred_element_type=jnp.float32) + b
            if l != n_layers - 1:
                acc = jnp.maximum(acc, 0.0)                     # ReLU on all but last
                h = acc.astype(compute_dtype)                   # keep MXU inputs narrow
            else:
                h = acc                                         # last layer stays f32
        o_ref[...] = h.astype(o_ref.dtype)

    return kernel


# ---------------------------------------------------------------------------- params


def init_feat_decoder_params(key, feature_shape_list):
    """Deterministic synthetic params: list of (v, g, b) per conv layer.

    Mirrors the PyTorch module: weight_norm wraps the conv, so only (v, g, b) matter
    (the nn.init.normal_ on `.weight` is overwritten by the weight-norm pre-hook).
    """
    assert len(feature_shape_list) >= 2
    params = []
    for i in range(len(feature_shape_list) - 1):
        c_in = feature_shape_list[i]
        c_out = feature_shape_list[i + 1]
        key, k_v, k_g, k_b = jax.random.split(key, 4)
        v = jax.random.normal(k_v, (c_out, c_in), dtype=jnp.float32)  # conv v (O,I,1,1) squeezed
        g = jax.random.normal(k_g, (c_out,), dtype=jnp.float32)       # weight_norm gain
        b = jax.random.normal(k_b, (c_out,), dtype=jnp.float32)       # bias
        params.append((v, g, b))
    return params


def fold_weight_norm_params(params, compute_dtype=jnp.bfloat16):
    """Fold weight_norm once (outside jit): W = g * v / ||v||_2 per output channel."""
    folded = []
    for v, g, b in params:
        v = jnp.asarray(v, jnp.float32)
        g = jnp.asarray(g, jnp.float32)
        b = jnp.asarray(b, jnp.float32)
        norm = jnp.sqrt(jnp.sum(v * v, axis=1, keepdims=True))         # (O, 1)
        w_eff = (g[:, None] * v / norm).astype(compute_dtype)          # (O, I)
        b2d = b[:, None]                                               # (O, 1) f32
        folded.append((w_eff, b2d))
    return folded


# --------------------------------------------------------------------- VMEM budgeting


def _round_up(x, m):
    return ((x + m - 1) // m) * m


def _sublane_round(c, itemsize):
    """Round a channel count up to the physical sublane tile for its dtype."""
    return _round_up(c, max(1, 32 // itemsize))


def _estimate_vmem_bytes(tile_p, chans, io_itemsize, out_itemsize):
    """VMEM footprint with physical (sublane, lane) padding accounted for."""
    c0, c_out = chans[0], chans[-1]
    est = 2 * _sublane_round(c0, io_itemsize) * tile_p * io_itemsize          # input tile x2
    est += 2 * _sublane_round(c_out, out_itemsize) * tile_p * out_itemsize    # output tile x2
    for i in range(len(chans) - 1):
        ci, co = chans[i], chans[i + 1]
        est += 2 * _sublane_round(co, io_itemsize) * _round_up(ci, 128) * io_itemsize  # W x2
        est += 2 * _sublane_round(co, 4) * 128 * 4                                     # b x2
    est += 3 * _sublane_round(max(chans), 4) * tile_p * 4                     # f32 temporaries
    return est


@functools.lru_cache(maxsize=1)
def _vmem_budget_bytes():
    """~3/4 of physical VMEM: ~96 MiB on 128-MiB parts (v5e/v6e), ~48 MiB on v7x."""
    try:
        cap = int(pltpu.get_tpu_info().vmem_capacity_bytes)
    except Exception:
        cap = 64 * 1024 * 1024   # conservative fallback (v7x-sized)
    return max(32 * 1024 * 1024, (cap * 3) // 4)


# --------------------------------------------------------------------------- forward


@functools.partial(jax.jit, static_argnums=(2, 3, 4, 5))
def feat_decoder_forward(x_nchw, flat_folded_params, n_layers, tile_p=8192,
                         use_bf16=True, out_dtype=jnp.bfloat16):
    """Forward pass matching feat_decoder.forward on an NCHW input.

    flat_folded_params: (w_1, b_1, ..., w_L, b_L) from fold_weight_norm_params.
    """
    folded = [
        (flat_folded_params[2 * i], flat_folded_params[2 * i + 1])
        for i in range(n_layers)
    ]

    n, c0, h, w = x_nchw.shape
    hw = h * w
    chans = [c0] + [wl.shape[0] for wl, _ in folded]
    c_out = chans[-1]

    compute_dtype = jnp.bfloat16 if use_bf16 else jnp.float32
    io_itemsize = jnp.dtype(compute_dtype).itemsize
    out_itemsize = jnp.dtype(out_dtype).itemsize

    # Pixels-on-lanes layout: NCHW -> (N, C, H*W) is a free reshape (no transpose).
    x3d = x_nchw.reshape(n, c0, hw).astype(compute_dtype)

    # Pad the pixel axis only to the 128-lane granule (not to a tile multiple).
    hw_128 = _round_up(hw, 128)
    if hw_128 != hw:
        x3d = jnp.pad(x3d, ((0, 0), (0, 0), (0, hw_128 - hw)))

    # ---- lane-tile selection -------------------------------------------------------
    vmem_budget = _vmem_budget_bytes()
    tp = max(128, (min(tile_p, hw_128) // 128) * 128)
    while tp > 128 and _estimate_vmem_bytes(tp, chans, io_itemsize, out_itemsize) > vmem_budget:
        tp = max(128, ((tp // 2) // 128) * 128)

    # Make sure the grid has at least ~4 steps when batch is small, so both v7x
    # TensorCores get work (harmless per-step overhead on 1-TC v5e/v6e).
    min_total_steps = 4
    nblk = hw_128 // 128
    if n * pl.cdiv(hw_128, tp) < min_total_steps:
        target_px_steps = pl.cdiv(min_total_steps, n)
        tp = min(tp, max(1, nblk // target_px_steps) * 128)

    grid = (n, pl.cdiv(hw_128, tp))    # partial last pixel block handled by Pallas

    est = _estimate_vmem_bytes(tp, chans, io_itemsize, out_itemsize)
    vmem_limit = min(vmem_budget, max(32 * 1024 * 1024, 2 * est))

    # ---- specs ----------------------------------------------------------------------
    kernel_args = [x3d]
    in_specs = [pl.BlockSpec((None, c0, tp), lambda b, i: (b, 0, i))]
    for w_eff, b2d in folded:
        kernel_args.append(w_eff)
        kernel_args.append(b2d)
        in_specs.append(pl.BlockSpec(w_eff.shape, lambda b, i: (0, 0)))
        in_specs.append(pl.BlockSpec(b2d.shape, lambda b, i: (0, 0)))

    out = pl.pallas_call(
        _make_kernel(n_layers),
        out_shape=jax.ShapeDtypeStruct((n, c_out, hw_128), out_dtype),
        grid_spec=pltpu.PrefetchScalarGridSpec(
            num_scalar_prefetch=0,
            grid=grid,
            in_specs=in_specs,
            out_specs=pl.BlockSpec((None, c_out, tp), lambda b, i: (b, 0, i)),
        ),
        compiler_params=pltpu.CompilerParams(
            dimension_semantics=("parallel", "parallel"),
            vmem_limit_bytes=vmem_limit),
    )(*kernel_args)

    if hw_128 != hw:
        out = out[:, :, :hw]
    # (N, C_out, H*W) -> NCHW is again a free reshape.
    return out.reshape(n, c_out, h, w)


# -------------------------------------------------------------------------- reference


def _reference_forward(x_nchw, params, use_bf16=True, out_dtype=jnp.bfloat16):
    """Plain-JAX reference with the same dtype pipeline as the kernel."""
    compute_dtype = jnp.bfloat16 if use_bf16 else jnp.float32
    n, c0, h, w = x_nchw.shape
    x = x_nchw.reshape(n, c0, h * w).astype(compute_dtype)
    n_layers = len(params)
    for l, (v, g, b) in enumerate(params):
        norm = jnp.sqrt(jnp.sum(v * v, axis=1, keepdims=True))
        w_eff = (g[:, None] * v / norm).astype(compute_dtype)
        acc = jnp.einsum("oi,nip->nop", w_eff, x,
                         preferred_element_type=jnp.float32)
        acc = acc + b.astype(jnp.float32)[None, :, None]
        if l != n_layers - 1:
            acc = jnp.maximum(acc, 0.0)
            x = acc.astype(compute_dtype)
        else:
            x = acc
    c_out = params[-1][0].shape[0]
    return x.reshape(n, c_out, h, w).astype(out_dtype)


# ------------------------------------------------------------------------------ main


if __name__ == "__main__":
    key = jax.random.PRNGKey(0)
    feature_shape_list = [4, 32, 16, 8]       # 3 conv layers, ReLU after first two
    n_layers = len(feature_shape_list) - 1

    k_x1, k_x2, k_p = jax.random.split(key, 3)
    params = init_feat_decoder_params(k_p, feature_shape_list)
    folded = fold_weight_norm_params(params, compute_dtype=jnp.bfloat16)
    flat_folded = tuple(t for layer in folded for t in layer)

    # Test 1: nicely 128-aligned spatial size.
    x1 = jax.random.normal(k_x1, (2, feature_shape_list[0], 16, 16), dtype=jnp.float32)
    y1 = feat_decoder_forward(x1, flat_folded, n_layers, 8192, True, jnp.bfloat16)
    y1 = jax.block_until_ready(y1)
    y1_ref = _reference_forward(x1, params, use_bf16=True, out_dtype=jnp.bfloat16)
    assert y1.shape == (2, feature_shape_list[-1], 16, 16), y1.shape
    d1 = jnp.max(jnp.abs(y1.astype(jnp.float32) - y1_ref.astype(jnp.float32)))
    assert jnp.allclose(y1.astype(jnp.float32), y1_ref.astype(jnp.float32),
                        atol=2e-2, rtol=2e-2), float(d1)

    # Test 2: awkward spatial size (25x25 -> 625 pixels) exercising 128-lane padding
    # and the partial last pixel tile of the cdiv grid.
    x2 = jax.random.normal(k_x2, (2, feature_shape_list[0], 25, 25), dtype=jnp.float32)
    y2 = feat_decoder_forward(x2, flat_folded, n_layers, 8192, True, jnp.bfloat16)
    y2 = jax.block_until_ready(y2)
    y2_ref = _reference_forward(x2, params, use_bf16=True, out_dtype=jnp.bfloat16)
    assert y2.shape == (2, feature_shape_list[-1], 25, 25), y2.shape
    d2 = jnp.max(jnp.abs(y2.astype(jnp.float32) - y2_ref.astype(jnp.float32)))
    assert jnp.allclose(y2.astype(jnp.float32), y2_ref.astype(jnp.float32),
                        atol=2e-2, rtol=2e-2), float(d2)

    print("KERNEL_OK")
</pallas_src>

<mosaic_0001>
module attributes {stable_mosaic.version = 11 : i64} {
  func.func @kernel(%arg0: i32, %arg1: i32, %arg2: memref<1x4x128xbf16, #tpu.memory_space<vmem>>, %arg3: memref<32x4xbf16, #tpu.memory_space<vmem>>, %arg4: memref<32x1xf32, #tpu.memory_space<vmem>>, %arg5: memref<16x32xbf16, #tpu.memory_space<vmem>>, %arg6: memref<16x1xf32, #tpu.memory_space<vmem>>, %arg7: memref<8x16xbf16, #tpu.memory_space<vmem>>, %arg8: memref<8x1xf32, #tpu.memory_space<vmem>>, %arg9: memref<1x8x128xbf16, #tpu.memory_space<vmem>>) attributes {dimension_semantics = [#tpu.dimension_semantics<parallel>, #tpu.dimension_semantics<parallel>], iteration_bounds = array<i64: 2, 2>, scalar_prefetch = 0 : i64, scratch_operands = 0 : i64, tpu.core_type = #tpu.core_type<tc>, window_params = [{transform_indices = @transform_0, window_bounds = array<i64: 1, 4, 128>}, {pipeline_mode = #tpu.pipeline_mode<synchronous>, transform_indices = @transform_1, window_bounds = array<i64: 32, 4>}, {pipeline_mode = #tpu.pipeline_mode<synchronous>, transform_indices = @transform_2, window_bounds = array<i64: 32, 1>}, {pipeline_mode = #tpu.pipeline_mode<synchronous>, transform_indices = @transform_3, window_bounds = array<i64: 16, 32>}, {pipeline_mode = #tpu.pipeline_mode<synchronous>, transform_indices = @transform_4, window_bounds = array<i64: 16, 1>}, {pipeline_mode = #tpu.pipeline_mode<synchronous>, transform_indices = @transform_5, window_bounds = array<i64: 8, 16>}, {pipeline_mode = #tpu.pipeline_mode<synchronous>, transform_indices = @transform_6, window_bounds = array<i64: 8, 1>}, {transform_indices = @transform_7, window_bounds = array<i64: 1, 8, 128>}]} {
    %c0 = arith.constant 0 : index
    %c0_0 = arith.constant 0 : index
    %c0_1 = arith.constant 0 : index
    %0 = vector.load %arg2[%c0, %c0_0, %c0_1] : memref<1x4x128xbf16, #tpu.memory_space<vmem>>, vector<1x4x128xbf16>
    %1 = vector.shape_cast %0 : vector<1x4x128xbf16> to vector<4x128xbf16>
    %c0_2 = arith.constant 0 : index
    %c0_3 = arith.constant 0 : index
    %2 = vector.load %arg3[%c0_2, %c0_3] : memref<32x4xbf16, #tpu.memory_space<vmem>>, vector<32x4xbf16>
    %c0_4 = arith.constant 0 : index
    %c0_5 = arith.constant 0 : index
    %3 = vector.load %arg4[%c0_4, %c0_5] : memref<32x1xf32, #tpu.memory_space<vmem>>, vector<32x1xf32>
    %cst = arith.constant dense<0.000000e+00> : vector<32x128xf32>
    %4 = tpu.matmul %2, %1, %cst {dimension_numbers = #tpu.dot_dimension_numbers<[1], [0], [0], [1], [0, 0, 1, 1], [], []>} : vector<32x4xbf16>, vector<4x128xbf16>, vector<32x128xf32> -> vector<32x128xf32>
    %5 = vector.broadcast %3 : vector<32x1xf32> to vector<32x128xf32>
    %6 = arith.addf %4, %5 : vector<32x128xf32>
    %cst_6 = arith.constant 0.000000e+00 : f32
    %7 = vector.broadcast %cst_6 : f32 to vector<32x128xf32>
    %8 = arith.maximumf %6, %7 : vector<32x128xf32>
    %9 = arith.truncf %8 : vector<32x128xf32> to vector<32x128xbf16>
    %c0_7 = arith.constant 0 : index
    %c0_8 = arith.constant 0 : index
    %10 = vector.load %arg5[%c0_7, %c0_8] : memref<16x32xbf16, #tpu.memory_space<vmem>>, vector<16x32xbf16>
    %c0_9 = arith.constant 0 : index
    %c0_10 = arith.constant 0 : index
    %11 = vector.load %arg6[%c0_9, %c0_10] : memref<16x1xf32, #tpu.memory_space<vmem>>, vector<16x1xf32>
    %cst_11 = arith.constant dense<0.000000e+00> : vector<16x128xf32>
    %12 = tpu.matmul %10, %9, %cst_11 {dimension_numbers = #tpu.dot_dimension_numbers<[1], [0], [0], [1], [0, 0, 1, 1], [], []>} : vector<16x32xbf16>, vector<32x128xbf16>, vector<16x128xf32> -> vector<16x128xf32>
    %13 = vector.broadcast %11 : vector<16x1xf32> to vector<16x128xf32>
    %14 = arith.addf %12, %13 : vector<16x128xf32>
    %cst_12 = arith.constant 0.000000e+00 : f32
    %15 = vector.broadcast %cst_12 : f32 to vector<16x128xf32>
    %16 = arith.maximumf %14, %15 : vector<16x128xf32>
    %17 = arith.truncf %16 : vector<16x128xf32> to vector<16x128xbf16>
    %c0_13 = arith.constant 0 : index
    %c0_14 = arith.constant 0 : index
    %18 = vector.load %arg7[%c0_13, %c0_14] : memref<8x16xbf16, #tpu.memory_space<vmem>>, vector<8x16xbf16>
    %c0_15 = arith.constant 0 : index
    %c0_16 = arith.constant 0 : index
    %19 = vector.load %arg8[%c0_15, %c0_16] : memref<8x1xf32, #tpu.memory_space<vmem>>, vector<8x1xf32>
    %cst_17 = arith.constant dense<0.000000e+00> : vector<8x128xf32>
    %20 = tpu.matmul %18, %17, %cst_17 {dimension_numbers = #tpu.dot_dimension_numbers<[1], [0], [0], [1], [0, 0, 1, 1], [], []>} : vector<8x16xbf16>, vector<16x128xbf16>, vector<8x128xf32> -> vector<8x128xf32>
    %21 = vector.broadcast %19 : vector<8x1xf32> to vector<8x128xf32>
    %22 = arith.addf %20, %21 : vector<8x128xf32>
    %23 = arith.truncf %22 : vector<8x128xf32> to vector<8x128xbf16>
    %c0_18 = arith.constant 0 : index
    %c0_19 = arith.constant 0 : index
    %c0_20 = arith.constant 0 : index
    %24 = vector.load %arg9[%c0_18, %c0_19, %c0_20] : memref<1x8x128xbf16, #tpu.memory_space<vmem>>, vector<1x8x128xbf16>
    %25 = vector.shape_cast %24 : vector<1x8x128xbf16> to vector<8x128xbf16>
    %26 = vector.shape_cast %23 : vector<8x128xbf16> to vector<1x8x128xbf16>
    tpu.vector_store %arg9[%c0_18, %c0_19, %c0_20], %26 {strides = array<i32>} : memref<1x8x128xbf16, #tpu.memory_space<vmem>>, vector<1x8x128xbf16>,
    return
  }
  func.func @transform_0(%arg0: i32, %arg1: i32) -> (i32, i32, i32) {
    %c0_i32 = arith.constant 0 : i32
    %c0_i32_0 = arith.constant 0 : i32
    return %arg0, %c0_i32, %arg1 : i32, i32, i32
  }
  func.func @transform_1(%arg0: i32, %arg1: i32) -> (i32, i32) {
    %c0_i32 = arith.constant 0 : i32
    %c0_i32_0 = arith.constant 0 : i32
    %c0_i32_1 = arith.constant 0 : i32
    return %c0_i32, %c0_i32_0 : i32, i32
  }
  func.func @transform_2(%arg0: i32, %arg1: i32) -> (i32, i32) {
    %c0_i32 = arith.constant 0 : i32
    %c0_i32_0 = arith.constant 0 : i32
    %c0_i32_1 = arith.constant 0 : i32
    return %c0_i32, %c0_i32_0 : i32, i32
  }
  func.func @transform_3(%arg0: i32, %arg1: i32) -> (i32, i32) {
    %c0_i32 = arith.constant 0 : i32
    %c0_i32_0 = arith.constant 0 : i32
    %c0_i32_1 = arith.constant 0 : i32
    return %c0_i32, %c0_i32_0 : i32, i32
  }
  func.func @transform_4(%arg0: i32, %arg1: i32) -> (i32, i32) {
    %c0_i32 = arith.constant 0 : i32
    %c0_i32_0 = arith.constant 0 : i32
    %c0_i32_1 = arith.constant 0 : i32
    return %c0_i32, %c0_i32_0 : i32, i32
  }
  func.func @transform_5(%arg0: i32, %arg1: i32) -> (i32, i32) {
    %c0_i32 = arith.constant 0 : i32
    %c0_i32_0 = arith.constant 0 : i32
    %c0_i32_1 = arith.constant 0 : i32
    return %c0_i32, %c0_i32_0 : i32, i32
  }
  func.func @transform_6(%arg0: i32, %arg1: i32) -> (i32, i32) {
    %c0_i32 = arith.constant 0 : i32
    %c0_i32_0 = arith.constant 0 : i32
    %c0_i32_1 = arith.constant 0 : i32
    return %c0_i32, %c0_i32_0 : i32, i32
  }
  func.func @transform_7(%arg0: i32, %arg1: i32) -> (i32, i32, i32) {
    %c0_i32 = arith.constant 0 : i32
    %c0_i32_0 = arith.constant 0 : i32
    return %arg0, %c0_i32, %arg1 : i32, i32, i32
  }
}

</mosaic_0001>

<bundles_post_ra>
// kernel: feat_decoder_forward.1
= control target key start
LH: loop header
LB: loop body
LE: loop exit
PB: predicated region body
PF: predicated region fallthrough
CT: control target
= control target key end

     0   :  { %s800_s24 = smov 0   ;;  %s802_s25 = smov 0   ;;  %s890_s0 = inlined_call_operand.vmem [shape: bf16[2,4,256], index: 0, kind: input, shape index: {}]   ;;  %s891_s1 = inlined_call_operand.vmem [shape: bf16[32,4], index: 1, kind: input, shape index: {}]   ;;  %s892_s2 = inlined_call_operand.vmem [shape: f32[32,1], index: 2, kind: input, shape index: {}]   ;;  %s893_s3 = inlined_call_operand.vmem [shape: bf16[16,32], index: 3, kind: input, shape index: {}]   ;;  %s894_s4 = inlined_call_operand.vmem [shape: f32[16,1], index: 4, kind: input, shape index: {}]   ;;  %s895_s5 = inlined_call_operand.vmem [shape: bf16[8,16], index: 5, kind: input, shape index: {}]   ;;  %s896_s6 = inlined_call_operand.vmem [shape: f32[8,1], index: 6, kind: input, shape index: {}]   ;;  %s897_s7 = inlined_call_operand.vmem [shape: bf16[2,8,256], index: 7, kind: output, shape index: {}]  }
   0x1   :  { %s804_s26 = smov 0   ;;  %s806_s27 = smov 0  }
   0x2   :  { %s808_s28 = smov 0  }
   0x3 LB: > { %s26_s29 = sadd.s32 1, %s747_s26  ;;  %s29_s30 = sadd.s32 1, %s751_s27  ;;  %s755_s28 = sphi %s808_s28, %s17_s28   ;;  %s751_s27 = sphi %s806_s27, %s901_s27   ;;  %s747_s26 = sphi %s804_s26, %s900_s26   ;;  %s743_s25 = sphi %s802_s25, %s899_s25   ;;  %s739_s24 = sphi %s800_s24, %s898_s24  }
   0x4   : > { %p27_p0 = scmp.ge.s32.totalorder %s26_s29, 2  ;;  %p626_p1 = scmp.ge.s32.totalorder %s755_s28, 1 }
   0x5   : > { %p256_p2 = scmp.lt.s32.totalorder %s755_s28, 5 }
   0x6   : > { %s903_s29 = smov (%p27_p0, %s26_s29), 0  ;;  %s905_s30 = smov (!%p27_p0, %s29_s30), %s751_s27 }
   0x7   : > { %p257_p3 = pnand %p626_p1, %p256_p2  ;;  %p31_p4 = scmp.ge.s32.totalorder %s905_s30, 2 }
   0x8   : > { %p294_p5 = scmp.lt.s32.totalorder (!%p257_p3), %s743_s25, 1  ;;  %p296_p6 = scmp.lt.s32.totalorder (!%p257_p3), %s739_s24, 1  ;;  %v714_v0 = vld [vmem:[%s891_s1] sm:$0xff] (!%p257_p3)   ;;  %vm350_vm0 = vcmask (!%p257_p3), 31744   ;;  %v757_v2 = vmov (!%p257_p3), 0   ;;  %v318_v3 = vld [vmem:[%s892_s2 + $0x10] sm:$0xff] (!%p257_p3) }
   0x9   : > { %s907_s30 = smov (%p31_p4, %s905_s30), 0  ;;  %260 = sbr.rel (%p257_p3) target bundleno = 694 (0x2b6), region = 48 }
   0xa   : > { %650 = vmatprep.mubr.msk.bf16.mxu0 (!%p257_p3), %vm350_vm0, %v714_v0  ;;  %v316_v1 = vld [vmem:[%s892_s2] sm:$0xff] (!%p257_p3)  ;;  %712 = vset.pattern.permute.xlu0 (!%p257_p3), %v757_v2  ;;  %v317_v4 = vld [vmem:[%s892_s2 + $0x8] sm:$0xff] (!%p257_p3)  ;;  %v319_v5 = vld [vmem:[%s892_s2 + $0x18] sm:$0xff] (!%p257_p3)  ;;  %vm357_vm1 = vcmask (!%p257_p3), 1041408   ;;  %v758_v12 = vmov (!%p257_p3), 0.0   ;;  %vm759_vm2 = vmmov (!%p257_p3), 0  }
   0xb   : > { %713 = vset.pattern.permute.xlu1 (!%p257_p3), %v757_v2  ;;  %322 = vperm.xlu0 (!%p257_p3), %712, %v316_v1   ;;  %v715_v8 = vld [vmem:[%s891_s1 + $0x8] sm:$0xff] (!%p257_p3)   ;;  %v418_v9 = vld [vmem:[%s894_s4] sm:$0xff] (!%p257_p3)  ;;  %vm435_vm3 = vcmask (!%p257_p3), 261120   ;;  %vm490_vm4 = vcmask (!%p257_p3), 130048  }
   0xc   : > { %332 = vperm.xlu1 (!%p257_p3), %713, %v318_v3   ;;  %v419_v10 = vld [vmem:[%s894_s4 + $0x8] sm:$0xff] (!%p257_p3)  ;;  %v484_v11 = vld [vmem:[%s896_s6] sm:$0xff] (!%p257_p3)  ;;  %654 = vmatprep.subr.bf16.mxu1 (!%p257_p3), %v758_v12 }
   0xd   : > { %658 = vmatprep.mubr.msk.bf16.mxu1 (!%p257_p3), %vm759_vm2, %v758_v12  ;;  %v716_v31 = vld [vmem:[%s893_s3] sm:$0xff] (!%p257_p3)  }
   0xe   : > { %v483_v43 = vld [vmem:[%s895_s5] sm:$0xf] (!%p257_p3) }
   0xf   : > { %327 = vperm.xlu0 (!%p257_p3), %712, %v317_v4  }
  0x10   : > { %s909_s25 = smov (!%p294_p5, %s743_s25), 1  ;;  %s911_s24 = smov (!%p296_p6, %s739_s24), 1  ;;  %337 = vperm.xlu1 %713, %v319_v5  }
  0x11   : > { %s627_s14 = sshll.u32 %s909_s25, 1 }
  0x12   : > { %s840_s15 = sadd.s32 %s627_s14, %s911_s24 }
  0x13   : > { %s628_s20 = sshll.u32 %s840_s15, 1  ;;  %422 = vperm.xlu0 %712, %v418_v9   ;;  %s630_s19 = sshll.u32 %s840_s15, 2 }
  0x14   : > { %s301_s23 = scalar_lea.vmem %s890_s0, %s628_s20  ;;  %427 = vperm.xlu1 %713, %v419_v10   ;;  %s309_s22 = scalar_lea.vmem %s897_s7, %s630_s19 }
  0x15   : > { %v311_v6 = vld [vmem:[%s301_s23] sm:$0x3] }
  0x16   : > { %668 = vmatprep.subr.msk.bf16.mxu0 %vm357_vm1, %v311_v6  ;;  %v359_v7 = vsel %vm357_vm1, %v311_v6, 0 }
  0x17   : > { %649 = vmatpush3.bf16.msra.mxu0 %v359_v7  ;;  %487 = vperm.xlu0 %712, %v484_v11  }
  0x18   : > { %662 = vmatprep.subr.bf16.mxu0 %v758_v12 }
  0x1a   : > { %651 = vmatmul.mubr.msk.bf16.vlgmr.msra.gmra.mrb[0].mxu0 %vm350_vm0, %v715_v8 }
  0x1b   : > { %664 = vmatprep.mubr.msk.bf16.mxu0 %vm759_vm2, %v758_v12 }
  0x8a   : > { %v323_v14 = vpop.permute.xlu0 %322 }
  0x8b   : > { %v333_v13 = vpop.permute.xlu1 %332 }
  0x8e   : > { %v328_v21 = vpop.permute.xlu0 %327 }
  0x8f   : > { %v338_v18 = vpop.permute.xlu1 %337 }
  0x92   : > { %v423_v32 = vpop.permute.xlu0 %422 }
  0x93   : > { %v428_v36 = vpop.permute.xlu1 %427 }
  0x96   : > { %v488_v44 = vpop.permute.xlu0 %487 }
  0xed   : > { %v652_v15 = vpop.f32.mrb[0].mxu0 }
  0xee   : > { %v404_v16 = vadd.f32 %v652_v15, %v333_v13  ;;  %v395_v17 = vpop.f32.mrb[1].mxu0 }
  0xef   : > { %v396_v19 = vadd.f32 %v395_v17, %v323_v14  ;;  %v653_v20 = vpop.f32.mrb[2].mxu0 }
  0xf0   : > { %v407_v22 = vadd.f32 %v653_v20, %v338_v18  ;;  %v398_v23 = vpop.f32.mrb[3].mxu0  ;;  %v412_v25 = vmax.f32 %v404_v16, 0.0 }
  0xf1   : > { %v399_v24 = vadd.f32 %v398_v23, %v328_v21  ;;  %v410_v27 = vmax.f32 %v396_v19, 0.0 }
  0xf2   : > { %v413_v26 = vmax.f32 %v407_v22, 0.0 }
  0xf3   : > { %v411_v28 = vmax.f32 %v399_v24, 0.0 }
  0xf4   : > { %v415_v29 = vpack.c.bf16 %v413_v26, %v412_v25 }
  0xf5   : > { %v414_v30 = vpack.c.bf16 %v411_v28, %v410_v27 }
  0xf7   : > { %655 = vmatpush3.bf16.msra.mxu1 %v414_v30 }
  0xf8   : > { %656 = vmatprep.subr.bf16.mxu1 %v758_v12 }
  0xfb   : > { %657 = vmatpush3.bf16.msra.mxu1 %v415_v29 }
  0xfe   : > { %659 = vmatmul.mubr.msk.bf16.vlgmr.msra.gmra.mrb[0].mxu1 %vm435_vm3, %v716_v31 }
 0x1d1   : > { %v473_v33 = vpop.f32.mrb[0].mxu1 }
 0x1d2   : > { %v474_v34 = vadd.f32 %v473_v33, %v423_v32  ;;  %v660_v35 = vpop.f32.mrb[1].mxu1 }
 0x1d3   : > { %v476_v37 = vpop.f32.mrb[2].mxu1 }
 0x1d4   : > { %v477_v38 = vadd.f32 %v476_v37, %v428_v36  ;;  %v661_v39 = vpop.f32.mrb[3].mxu1  ;;  %v480_v40 = vmax.f32 %v474_v34, 0.0 }
 0x1d6   : > { %v481_v41 = vmax.f32 %v477_v38, 0.0 }
 0x1d8   : > { %v482_v42 = vpack.c.bf16 %v481_v41, %v480_v40 }
 0x1da   : > { %663 = vmatpush3.bf16.msra.mxu0 %v482_v42 }
 0x1dd   : > { %665 = vmatmul.mubr.msk.bf16.vlgmr.msra.gmra.mrb[4].mxu0 %vm490_vm4, %v483_v43 }
 0x2b0   : > { %v528_v45 = vpop.f32.mrb[4].mxu0 }
 0x2b1   : > { %v529_v46 = vadd.f32 %v528_v45, %v488_v44  ;;  %v666_v47 = vpop.f32.mrb[5].mxu0 }
 0x2b2   : > { %v531_v48 = vpop.f32.mrb[6].mxu0 }
 0x2b3   : > { %v534_v49 = vpack.c.bf16 %v529_v46, %v529_v46  ;;  %v667_v50 = vpop.f32.mrb[7].mxu0 }
 0x2b5   : > { %535 = vst [vmem:[%s309_s22] sm:$0xf] %v534_v49 }
 0x2b6 PF: > { %s17_s28 = sadd.s32 1, %s755_s28   ;;  %s898_s24 = smov %s747_s26 }
 0x2b7   : > { %p14_p7 = scmp.ge.s32.totalorder %s17_s28, 6   ;;  %s899_s25 = smov %s751_s27 }
 0x2b8   : > { %s900_s26 = smov %s903_s29  ;;  %s901_s27 = smov %s907_s30 }
 0x2b9   :  { %16 = sbr.rel (!%p14_p7) target bundleno = 3 (0x3), region = 78 }

</bundles_post_ra>
